<compile_context>
chip_gen: v5e
topology: v5e:2x2
jax: 0.10.0
libtpu: 0.0.40
codegen_flags: <defaults>
</compile_context>

<pallas_src>
import functools
import numpy as np
import jax
import jax.numpy as jnp
from jax.experimental import pallas as pl
from jax.experimental.pallas import tpu as pltpu

_BLOCK_BYTES_F32 = 2 * 1024 * 1024   # per-block input budget, f32-equivalent bytes
_MIN_GRID_STEPS = 8                   # keep >=2 (target ~8) grid steps for v7x megacore


@functools.lru_cache(maxsize=1)
def _vmem_limit_bytes():
    # ~5/8 of physical VMEM: ~80 MiB on v5e/v6e (128 MiB phys), ~40 MiB on v7x (64 MiB).
    try:
        cap = pltpu.get_tpu_info().vmem_capacity_bytes
        return int(min(cap * 5 // 8, 80 * 1024 * 1024))
    except Exception:
        return 40 * 1024 * 1024


@functools.lru_cache(maxsize=1)
def _is_v5e():
    try:
        kind = jax.devices()[0].device_kind.lower()
    except Exception:
        return False
    return ("v5e" in kind) or ("v5 lite" in kind) or ("v5lite" in kind)


def _cparams(grid_rank):
    return pltpu.CompilerParams(
        dimension_semantics=("parallel",) * grid_rank,
        vmem_limit_bytes=_vmem_limit_bytes())


def _sublane_mult(dtype):
    # f32 -> 8, bf16 -> 16, int8/fp8 -> 32 (sublane packing).
    return 8 * max(1, 4 // jnp.dtype(dtype).itemsize)


def _row_tile(n_rows, n_cols, mult, min_steps=_MIN_GRID_STEPS):
    """Row-tile (multiple of `mult`) sized from an f32-equivalent VMEM budget,
    capped so the parallel grid keeps >= min_steps steps when possible."""
    row_bytes = max(n_cols, 1) * 4                        # f32-equivalent (kernel temps)
    budget = max((_BLOCK_BYTES_F32 // row_bytes) // mult * mult, mult)
    desired = -(-n_rows // max(min_steps, 1))             # cdiv(n_rows, min_steps)
    desired = max(-(-desired // mult) * mult, mult)       # round up to mult
    t = min(budget, desired)
    return n_rows if t >= n_rows else t


# ---------------------------------------------------------------------------
# Kernels
# ---------------------------------------------------------------------------

def _ln_rows_kernel(x_ref, w_ref, b_ref, o_ref, *, eps, inv_c):
    """Normalize each row of a (tile_m, C) block over the lane (C) axis."""
    x = x_ref[...].astype(jnp.float32)
    mean = jnp.sum(x, axis=-1, keepdims=True) * inv_c
    xc = x - mean
    var = jnp.sum(xc * xc, axis=-1, keepdims=True) * inv_c   # biased, two-pass
    inv = jax.lax.rsqrt(var + eps)
    w = w_ref[...].astype(jnp.float32)        # (1, C)
    b = b_ref[...].astype(jnp.float32)
    o_ref[...] = (xc * inv * w + b).astype(o_ref.dtype)


def _ln_folded_kernel(x_ref, w_ref, b_ref, o_ref, *, eps, inv_c, c):
    """channels_last, lane-dense: k = 128//c rows folded into one 128-wide row.

    Per-segment mean/var come from a (128,128) block-diagonal ones matrix on the
    otherwise-idle MXU; the matrix is built in-kernel (no HBM stream)."""
    x = x_ref[...].astype(jnp.float32)        # (tile_m, 128)
    li = jax.lax.broadcasted_iota(jnp.int32, (128, 128), 0) // c
    lj = jax.lax.broadcasted_iota(jnp.int32, (128, 128), 1) // c
    bd = (li == lj).astype(jnp.float32)       # block-diagonal ones
    mean = jnp.dot(x, bd, preferred_element_type=jnp.float32) * inv_c
    xc = x - mean
    var = jnp.dot(xc * xc, bd, preferred_element_type=jnp.float32) * inv_c
    inv = jax.lax.rsqrt(var + eps)
    w = w_ref[...].astype(jnp.float32)        # (1, 128) = weight tiled k times
    b = b_ref[...].astype(jnp.float32)
    o_ref[...] = (xc * inv * w + b).astype(o_ref.dtype)


def _ln_cf_kernel(x_ref, w_ref, b_ref, o_ref, *, eps, inv_c):
    """channels_first: normalize a (C, tile_hw) block over the sublane (C) axis."""
    x = x_ref[...].astype(jnp.float32)        # (C, tile_hw)
    mean = jnp.sum(x, axis=0, keepdims=True) * inv_c
    xc = x - mean
    var = jnp.sum(xc * xc, axis=0, keepdims=True) * inv_c
    inv = jax.lax.rsqrt(var + eps)
    w = w_ref[...].astype(jnp.float32)        # (C, 1)
    b = b_ref[...].astype(jnp.float32)
    o_ref[...] = (xc * inv * w + b).astype(o_ref.dtype)


def _ln_cf_folded_kernel(x_ref, w_ref, b_ref, o_ref, *, eps, inv_c, hw):
    """channels_first, lane-dense for HW < 128: k = 128//hw channels folded into
    one 128-wide lane row (free NCHW view).  Reduce over the (C//k) sublane rows
    on the VPU, then across the k lane segments with a comb matrix on the MXU."""
    x = x_ref[...].astype(jnp.float32)        # (tile_n, C//k, 128)
    li = jax.lax.broadcasted_iota(jnp.int32, (128, 128), 0) % hw
    lj = jax.lax.broadcasted_iota(jnp.int32, (128, 128), 1) % hw
    comb = (li == lj).astype(jnp.float32)     # sums lanes with equal (lane % hw)
    s1 = jnp.sum(x, axis=1)                   # (tile_n, 128)
    mean = (jnp.dot(s1, comb, preferred_element_type=jnp.float32) * inv_c)[:, None, :]
    xc = x - mean
    s2 = jnp.sum(xc * xc, axis=1)
    var = (jnp.dot(s2, comb, preferred_element_type=jnp.float32) * inv_c)[:, None, :]
    inv = jax.lax.rsqrt(var + eps)
    w = w_ref[...].astype(jnp.float32)        # (C//k, 128)
    b = b_ref[...].astype(jnp.float32)
    o_ref[...] = (xc * inv * w + b).astype(o_ref.dtype)


# ---------------------------------------------------------------------------
# channels_last wrappers
# ---------------------------------------------------------------------------

def _ln_rows_call(x2, weight, bias, eps):
    M, C = x2.shape
    tile_m = _row_tile(M, C, _sublane_mult(x2.dtype))
    grid = (pl.cdiv(M, tile_m),)
    return pl.pallas_call(
        functools.partial(_ln_rows_kernel, eps=eps, inv_c=1.0 / C),
        out_shape=jax.ShapeDtypeStruct((M, C), x2.dtype),
        grid=grid,
        in_specs=[
            pl.BlockSpec((tile_m, C), lambda i: (i, 0)),
            pl.BlockSpec((1, C), lambda i: (0, 0)),
            pl.BlockSpec((1, C), lambda i: (0, 0)),
        ],
        out_specs=pl.BlockSpec((tile_m, C), lambda i: (i, 0)),
        compiler_params=_cparams(1),
    )(x2, weight.reshape(1, C), bias.reshape(1, C))


def _ln_folded_call(x2, weight, bias, eps):
    M, C = x2.shape                            # M is a multiple of k here
    k = 128 // C
    M2 = M // k
    x_f = x2.reshape(M2, 128)                  # free row-major view
    w_f = jnp.tile(weight.reshape(1, C), (1, k))
    b_f = jnp.tile(bias.reshape(1, C), (1, k))
    tile_m = _row_tile(M2, 128, _sublane_mult(x2.dtype))
    grid = (pl.cdiv(M2, tile_m),)
    y_f = pl.pallas_call(
        functools.partial(_ln_folded_kernel, eps=eps, inv_c=1.0 / C, c=C),
        out_shape=jax.ShapeDtypeStruct((M2, 128), x2.dtype),
        grid=grid,
        in_specs=[
            pl.BlockSpec((tile_m, 128), lambda i: (i, 0)),
            pl.BlockSpec((1, 128), lambda i: (0, 0)),
            pl.BlockSpec((1, 128), lambda i: (0, 0)),
        ],
        out_specs=pl.BlockSpec((tile_m, 128), lambda i: (i, 0)),
        compiler_params=_cparams(1),
    )(x_f, w_f, b_f)
    return y_f.reshape(M, C)


def _layernorm_channels_last(x, weight, bias, eps):
    C = x.shape[-1]
    lead = x.shape[:-1]
    M = int(np.prod(lead)) if lead else 1
    x2 = x.reshape(M, C)
    # Lane-dense folded path for small C.  Gated off on v5e: the two f32
    # segment-sum MXU matmuls would make the kernel MXU-bound there
    # (197 TF/s vs ~0.82 TB/s HBM); on v6e/v7x they stay hidden under HBM.
    use_folded = (0 < C < 128 and 128 % C == 0 and M >= 128 // C and not _is_v5e())
    if use_folded:
        k = 128 // C
        M_main = (M // k) * k
        y_main = _ln_folded_call(x2[:M_main], weight, bias, eps)
        if M_main == M:
            return y_main.reshape(x.shape)
        # <k leftover rows: tiny plain call instead of forfeiting the
        # lane-dense path for the whole tensor.
        y_tail = _ln_rows_call(x2[M_main:], weight, bias, eps)
        return jnp.concatenate([y_main, y_tail], axis=0).reshape(x.shape)
    return _ln_rows_call(x2, weight, bias, eps).reshape(x.shape)


# ---------------------------------------------------------------------------
# channels_first wrapper (NCHW, normalize over C) — no HBM transposes
# ---------------------------------------------------------------------------

def _layernorm_channels_first(x, weight, bias, eps):
    assert x.ndim == 4, "channels_first path expects NCHW"
    N, C = x.shape[0], x.shape[1]
    HW = int(np.prod(x.shape[2:]))
    inv_c = 1.0 / C

    # Lane-dense folded path for small feature maps (e.g. 8x8, 4x4): avoids
    # HW-wide masked vst.msk stores.  MXU load here is tiny (matmul operates on
    # the already C//k-reduced stats), so it is kept on all generations.
    if 0 < HW < 128 and 128 % HW == 0 and C % (128 // HW) == 0:
        k = 128 // HW
        Rw = C // k
        x3 = x.reshape(N, Rw, 128)             # free view of contiguous NCHW
        w_f = jnp.broadcast_to(weight.reshape(Rw, k, 1), (Rw, k, HW)).reshape(Rw, 128)
        b_f = jnp.broadcast_to(bias.reshape(Rw, k, 1), (Rw, k, HW)).reshape(Rw, 128)
        tile_n = _row_tile(N, Rw * 128, 1)
        grid = (pl.cdiv(N, tile_n),)
        y3 = pl.pallas_call(
            functools.partial(_ln_cf_folded_kernel, eps=eps, inv_c=inv_c, hw=HW),
            out_shape=jax.ShapeDtypeStruct((N, Rw, 128), x.dtype),
            grid=grid,
            in_specs=[
                pl.BlockSpec((tile_n, Rw, 128), lambda i: (i, 0, 0)),
                pl.BlockSpec((Rw, 128), lambda i: (0, 0)),
                pl.BlockSpec((Rw, 128), lambda i: (0, 0)),
            ],
            out_specs=pl.BlockSpec((tile_n, Rw, 128), lambda i: (i, 0, 0)),
            compiler_params=_cparams(1),
        )(x3, w_f, b_f)
        return y3.reshape(x.shape)

    # General path: view as (N, C, HW), reduce over the sublane (C) axis with
    # HW tiled 128-wide on the lane axis.
    x3 = x.reshape(N, C, HW)
    hw_steps = max(1, -(-_MIN_GRID_STEPS // max(N, 1)))   # total steps ~ _MIN_GRID_STEPS
    tile_hw = _row_tile(HW, C, 128, min_steps=hw_steps)
    grid = (N, pl.cdiv(HW, tile_hw))
    y3 = pl.pallas_call(
        functools.partial(_ln_cf_kernel, eps=eps, inv_c=inv_c),
        out_shape=jax.ShapeDtypeStruct((N, C, HW), x.dtype),
        grid=grid,
        in_specs=[
            pl.BlockSpec((None, C, tile_hw), lambda n, j: (n, 0, j)),
            pl.BlockSpec((C, 1), lambda n, j: (0, 0)),
            pl.BlockSpec((C, 1), lambda n, j: (0, 0)),
        ],
        out_specs=pl.BlockSpec((None, C, tile_hw), lambda n, j: (n, 0, j)),
        compiler_params=_cparams(2),
    )(x3, weight.reshape(C, 1), bias.reshape(C, 1))
    return y3.reshape(x.shape)


def layer_norm(x, weight, bias, *, eps=1e-6, data_format="channels_last"):
    if data_format not in ("channels_last", "channels_first"):
        raise NotImplementedError
    if data_format == "channels_first":
        return _layernorm_channels_first(x, weight, bias, eps)
    return _layernorm_channels_last(x, weight, bias, eps)


# ---------------------------------------------------------------------------
# Reference + test
# ---------------------------------------------------------------------------

def _reference(x, weight, bias, eps, data_format):
    if data_format == "channels_last":
        mean = jnp.mean(x, axis=-1, keepdims=True)
        var = jnp.mean((x - mean) ** 2, axis=-1, keepdims=True)
        return (x - mean) / jnp.sqrt(var + eps) * weight + bias
    else:
        u = jnp.mean(x, axis=1, keepdims=True)
        s = jnp.mean((x - u) ** 2, axis=1, keepdims=True)
        xn = (x - u) / jnp.sqrt(s + eps)
        return weight[:, None, None] * xn + bias[:, None, None]


if __name__ == "__main__":
    key = jax.random.PRNGKey(0)
    kx1, kx2, kx3, kx4, kw, kb = jax.random.split(key, 6)

    C = 32
    eps = 1e-6
    weight = 1.0 + 0.1 * jax.random.normal(kw, (C,), dtype=jnp.float32)
    bias = 0.1 * jax.random.normal(kb, (C,), dtype=jnp.float32)

    def check(y, ref):
        np.testing.assert_allclose(np.asarray(y), np.asarray(ref), rtol=1e-4, atol=1e-4)

    # channels_first, small feature map (HW=64 < 128) -> lane-dense folded CF path.
    x_cf = jax.random.normal(kx1, (2, C, 8, 8), dtype=jnp.float32)
    y_cf = jax.block_until_ready(
        layer_norm(x_cf, weight, bias, eps=eps, data_format="channels_first"))
    check(y_cf, _reference(x_cf, weight, bias, eps, "channels_first"))

    # channels_first, larger feature map (HW=256) -> general sublane-reduce path.
    x_cf2 = jax.random.normal(kx2, (2, C, 16, 16), dtype=jnp.float32)
    y_cf2 = jax.block_until_ready(
        layer_norm(x_cf2, weight, bias, eps=eps, data_format="channels_first"))
    check(y_cf2, _reference(x_cf2, weight, bias, eps, "channels_first"))

    # channels_last, M divisible by k -> lane-dense folded path (plain on v5e).
    x_cl = jax.random.normal(kx3, (2, 8, 8, C), dtype=jnp.float32)
    y_cl = jax.block_until_ready(
        layer_norm(x_cl, weight, bias, eps=eps, data_format="channels_last"))
    check(y_cl, _reference(x_cl, weight, bias, eps, "channels_last"))

    # channels_last, odd leading size (M=15, k=4) -> folded main + tiny plain tail.
    x_odd = jax.random.normal(kx4, (3, 5, C), dtype=jnp.float32)
    y_odd = jax.block_until_ready(
        layer_norm(x_odd, weight, bias, eps=eps, data_format="channels_last"))
    check(y_odd, _reference(x_odd, weight, bias, eps, "channels_last"))

    print("KERNEL_OK")
</pallas_src>

<mosaic_0001>
module attributes {stable_mosaic.version = 11 : i64} {
  func.func @_ln_cf_folded_kernel(%arg0: i32, %arg1: memref<1x16x128xf32, #tpu.memory_space<vmem>>, %arg2: memref<16x128xf32, #tpu.memory_space<vmem>>, %arg3: memref<16x128xf32, #tpu.memory_space<vmem>>, %arg4: memref<1x16x128xf32, #tpu.memory_space<vmem>>) attributes {dimension_semantics = [#tpu.dimension_semantics<parallel>], iteration_bounds = array<i64: 2>, scalar_prefetch = 0 : i64, scratch_operands = 0 : i64, tpu.core_type = #tpu.core_type<tc>, window_params = [{transform_indices = @transform_0, window_bounds = array<i64: 1, 16, 128>}, {pipeline_mode = #tpu.pipeline_mode<synchronous>, transform_indices = @transform_1, window_bounds = array<i64: 16, 128>}, {pipeline_mode = #tpu.pipeline_mode<synchronous>, transform_indices = @transform_2, window_bounds = array<i64: 16, 128>}, {transform_indices = @transform_3, window_bounds = array<i64: 1, 16, 128>}]} {
    %c0 = arith.constant 0 : index
    %c0_0 = arith.constant 0 : index
    %c0_1 = arith.constant 0 : index
    %0 = vector.load %arg1[%c0, %c0_0, %c0_1] : memref<1x16x128xf32, #tpu.memory_space<vmem>>, vector<1x16x128xf32>
    %1 = tpu.iota {dimensions = array<i32: 0>} : vector<128x128xi32>
    %c64_i32 = arith.constant 64 : i32
    %c0_i32 = arith.constant 0 : i32
    %2 = arith.cmpi eq, %c64_i32, %c0_i32 : i32
    %c1_i32 = arith.constant 1 : i32
    %3 = arith.select %2, %c1_i32, %c64_i32 : i32
    %4 = vector.broadcast %3 : i32 to vector<128x128xi32>
    %5 = arith.remsi %1, %4 : vector<128x128xi32>
    %c0_i32_2 = arith.constant 0 : i32
    %6 = vector.broadcast %c0_i32_2 : i32 to vector<128x128xi32>
    %7 = arith.cmpi ne, %5, %6 : vector<128x128xi32>
    %c0_i32_3 = arith.constant 0 : i32
    %8 = vector.broadcast %c0_i32_3 : i32 to vector<128x128xi32>
    %9 = arith.cmpi slt, %5, %8 : vector<128x128xi32>
    %c0_i32_4 = arith.constant 0 : i32
    %10 = arith.cmpi slt, %3, %c0_i32_4 : i32
    %11 = vector.broadcast %10 : i1 to vector<128x128xi1>
    %12 = vector.broadcast %11 : vector<128x128xi1> to vector<128x128xi1>
    %13 = arith.xori %9, %12 : vector<128x128xi1>
    %14 = arith.andi %13, %7 : vector<128x128xi1>
    %15 = vector.broadcast %3 : i32 to vector<128x128xi32>
    %16 = arith.addi %5, %15 : vector<128x128xi32>
    %17 = arith.select %14, %16, %5 : vector<128x128xi1>, vector<128x128xi32>
    %18 = tpu.iota {dimensions = array<i32: 1>} : vector<128x128xi32>
    %c64_i32_5 = arith.constant 64 : i32
    %c0_i32_6 = arith.constant 0 : i32
    %19 = arith.cmpi eq, %c64_i32_5, %c0_i32_6 : i32
    %c1_i32_7 = arith.constant 1 : i32
    %20 = arith.select %19, %c1_i32_7, %c64_i32_5 : i32
    %21 = vector.broadcast %20 : i32 to vector<128x128xi32>
    %22 = arith.remsi %18, %21 : vector<128x128xi32>
    %c0_i32_8 = arith.constant 0 : i32
    %23 = vector.broadcast %c0_i32_8 : i32 to vector<128x128xi32>
    %24 = arith.cmpi ne, %22, %23 : vector<128x128xi32>
    %c0_i32_9 = arith.constant 0 : i32
    %25 = vector.broadcast %c0_i32_9 : i32 to vector<128x128xi32>
    %26 = arith.cmpi slt, %22, %25 : vector<128x128xi32>
    %c0_i32_10 = arith.constant 0 : i32
    %27 = arith.cmpi slt, %20, %c0_i32_10 : i32
    %28 = vector.broadcast %27 : i1 to vector<128x128xi1>
    %29 = vector.broadcast %28 : vector<128x128xi1> to vector<128x128xi1>
    %30 = arith.xori %26, %29 : vector<128x128xi1>
    %31 = arith.andi %30, %24 : vector<128x128xi1>
    %32 = vector.broadcast %20 : i32 to vector<128x128xi32>
    %33 = arith.addi %22, %32 : vector<128x128xi32>
    %34 = arith.select %31, %33, %22 : vector<128x128xi1>, vector<128x128xi32>
    %35 = arith.cmpi eq, %17, %34 : vector<128x128xi32>
    %36 = arith.extui %35 : vector<128x128xi1> to vector<128x128xi32>
    %37 = arith.sitofp %36 : vector<128x128xi32> to vector<128x128xf32>
    %cst = arith.constant dense<0.000000e+00> : vector<1x128xf32>
    %38 = vector.multi_reduction <add>, %0, %cst [1] : vector<1x16x128xf32> to vector<1x128xf32>
    %cst_11 = arith.constant dense<0.000000e+00> : vector<1x128xf32>
    %39 = tpu.matmul %38, %37, %cst_11 {dimension_numbers = #tpu.dot_dimension_numbers<[1], [0], [0], [1], [0, 0, 1, 1], [], []>} : vector<1x128xf32>, vector<128x128xf32>, vector<1x128xf32> -> vector<1x128xf32>
    %cst_12 = arith.constant 3.125000e-02 : f32
    %40 = vector.broadcast %cst_12 : f32 to vector<1x128xf32>
    %41 = arith.mulf %39, %40 : vector<1x128xf32>
    %42 = vector.shape_cast %41 : vector<1x128xf32> to vector<1x1x128xf32>
    %43 = vector.broadcast %42 : vector<1x1x128xf32> to vector<1x16x128xf32>
    %44 = arith.subf %0, %43 : vector<1x16x128xf32>
    %45 = arith.mulf %44, %44 : vector<1x16x128xf32>
    %cst_13 = arith.constant dense<0.000000e+00> : vector<1x128xf32>
    %46 = vector.multi_reduction <add>, %45, %cst_13 [1] : vector<1x16x128xf32> to vector<1x128xf32>
    %cst_14 = arith.constant dense<0.000000e+00> : vector<1x128xf32>
    %47 = tpu.matmul %46, %37, %cst_14 {dimension_numbers = #tpu.dot_dimension_numbers<[1], [0], [0], [1], [0, 0, 1, 1], [], []>} : vector<1x128xf32>, vector<128x128xf32>, vector<1x128xf32> -> vector<1x128xf32>
    %cst_15 = arith.constant 3.125000e-02 : f32
    %48 = vector.broadcast %cst_15 : f32 to vector<1x128xf32>
    %49 = arith.mulf %47, %48 : vector<1x128xf32>
    %50 = vector.shape_cast %49 : vector<1x128xf32> to vector<1x1x128xf32>
    %cst_16 = arith.constant 9.99999997E-7 : f32
    %51 = vector.broadcast %cst_16 : f32 to vector<1x1x128xf32>
    %52 = arith.addf %50, %51 : vector<1x1x128xf32>
    %53 = math.rsqrt %52 : vector<1x1x128xf32>
    %c0_17 = arith.constant 0 : index
    %c0_18 = arith.constant 0 : index
    %54 = vector.load %arg2[%c0_17, %c0_18] : memref<16x128xf32, #tpu.memory_space<vmem>>, vector<16x128xf32>
    %c0_19 = arith.constant 0 : index
    %c0_20 = arith.constant 0 : index
    %55 = vector.load %arg3[%c0_19, %c0_20] : memref<16x128xf32, #tpu.memory_space<vmem>>, vector<16x128xf32>
    %56 = vector.broadcast %53 : vector<1x1x128xf32> to vector<1x16x128xf32>
    %57 = arith.mulf %44, %56 : vector<1x16x128xf32>
    %58 = vector.shape_cast %54 : vector<16x128xf32> to vector<1x16x128xf32>
    %59 = arith.mulf %57, %58 : vector<1x16x128xf32>
    %60 = vector.shape_cast %55 : vector<16x128xf32> to vector<1x16x128xf32>
    %61 = arith.addf %59, %60 : vector<1x16x128xf32>
    %c0_21 = arith.constant 0 : index
    %c0_22 = arith.constant 0 : index
    %c0_23 = arith.constant 0 : index
    %62 = vector.load %arg4[%c0_21, %c0_22, %c0_23] : memref<1x16x128xf32, #tpu.memory_space<vmem>>, vector<1x16x128xf32>
    tpu.vector_store %arg4[%c0_21, %c0_22, %c0_23], %61 {strides = array<i32>} : memref<1x16x128xf32, #tpu.memory_space<vmem>>, vector<1x16x128xf32>,
    return
  }
  func.func @transform_0(%arg0: i32) -> (i32, i32, i32) {
    %c0_i32 = arith.constant 0 : i32
    %c0_i32_0 = arith.constant 0 : i32
    %c0_i32_1 = arith.constant 0 : i32
    return %arg0, %c0_i32, %c0_i32_0 : i32, i32, i32
  }
  func.func @transform_1(%arg0: i32) -> (i32, i32) {
    %c0_i32 = arith.constant 0 : i32
    %c0_i32_0 = arith.constant 0 : i32
    %c0_i32_1 = arith.constant 0 : i32
    return %c0_i32, %c0_i32_0 : i32, i32
  }
  func.func @transform_2(%arg0: i32) -> (i32, i32) {
    %c0_i32 = arith.constant 0 : i32
    %c0_i32_0 = arith.constant 0 : i32
    %c0_i32_1 = arith.constant 0 : i32
    return %c0_i32, %c0_i32_0 : i32, i32
  }
  func.func @transform_3(%arg0: i32) -> (i32, i32, i32) {
    %c0_i32 = arith.constant 0 : i32
    %c0_i32_0 = arith.constant 0 : i32
    %c0_i32_1 = arith.constant 0 : i32
    return %arg0, %c0_i32, %c0_i32_0 : i32, i32, i32
  }
}

</mosaic_0001>

<bundles_post_ra>
// kernel: tpu_custom_call.1
= control target key start
LH: loop header
LB: loop body
LE: loop exit
PB: predicated region body
PF: predicated region fallthrough
CT: control target
= control target key end

     0   :  { %8 = vsyncpa [#allocation3], 0  ;;  %s1271_s0 = inlined_call_operand.hbm [shape: f32[2,16,128], index: 0, kind: input, shape index: {}]   ;;  %s1272_s1 = inlined_call_operand.hbm [shape: f32[16,128], index: 1, kind: input, shape index: {}]   ;;  %s1273_s2 = inlined_call_operand.hbm [shape: f32[16,128], index: 2, kind: input, shape index: {}]   ;;  %s1274_s3 = inlined_call_operand.hbm [shape: f32[2,16,128], index: 3, kind: output, shape index: {}]  }
   0x1   :  { %10 = vsyncpa [#allocation3 + $0x1], 0 }
   0x2   :  { %11 = vsyncpa [#allocation6], 0 }
   0x3   :  { %12 = vsyncpa [#allocation4], 0 }
   0x4   :  { %14 = vsyncpa [#allocation4 + $0x1], 0  ;;  %s1021_s12 = smov 0   ;;  %s1023_s13 = smov 0  }
   0x5   :  { %s1025_s14 = smov 0   ;;  %s1027_s15 = smov 0  }
   0x6 LB: > { %s1042_s16 = sadd.s32 4294967295, %s992_s15   ;;  %s690_s17 = sadd.s32 4294967294, %s992_s15   ;;  %s992_s15 = sphi %s1027_s15, %s1288_s15   ;;  %s988_s14 = sphi %s1025_s14, %s1287_s14   ;;  %s984_s13 = sphi %s1023_s13, %s1286_s13   ;;  %s980_s12 = sphi %s1021_s12, %s1285_s12  }
   0x7   : > { %p40_p0 = scmp.ne.s32.totalorder %s984_s13, %s980_s12  ;;  %p41_p1 = scmp.eq.s32.totalorder %s1042_s16, 0 }
   0x8   : > { %p106_p2 = scmp.eq.s32.totalorder %s1042_s16, 1  ;;  %p112_p3 = scmp.eq.s32.totalorder %s690_s17, 1 }
   0x9   : > { %p1051_p4 = por %p41_p1, %p40_p0  ;;  %p691_p5 = scmp.ge.s32.totalorder %s992_s15, 1 }
   0xa   : > { %p1056_p6 = por %p112_p3, %p40_p0  ;;  %p119_p7 = scmp.lt.s32.totalorder %s992_s15, 3 }
   0xb   : > { %s130_s22 = sshll.u32 %s1272_s1, 4  ;;  %s994_s24 = smov [#allocation5]   ;;  %s131_s22 = int_to_ptr.hbm [resolvable:$true] %s130_s22 }
   0xc   : > { %p1064_p8 = pnand %p691_p5, %p119_p7  ;;  %s132_s25 = sshll.u32 %s994_s24, 4  ;;  %s133_s25 = int_to_ptr.vmem [resolvable:$true] %s132_s25 }
   0xd   : > { %s144_s28 = sshll.u32 %s1273_s2, 4  ;;  %s995_s29 = smov 128   ;;  %s145_s28 = int_to_ptr.hbm [resolvable:$true] %s144_s28 }
   0xe   : > { %p770_p9 = pneg %p1064_p8  ;;  %s996_s30 = smov 8  }
   0xf   : > { %s997_s4 = smov [#allocation7]   ;;  %s1083_s6 = sadd.s32 1, %s992_s15  }
  0x10   : > { %p771_p10 = pnand %p770_p9, %p41_p1  ;;  %s146_s5 = sshll.u32 %s997_s4, 4  ;;  %s147_s5 = int_to_ptr.vmem [resolvable:$true] %s146_s5 }
  0x11   : > { %s27_s7 = sadd.s32 1, %s988_s14  ;;  %s24_s8 = ssub.s32 %s992_s15, %s1083_s6 }
  0x12   : > { %773 = dma.hbm_to_vmem [thread:$0]  (!%p771_p10), %s131_s22, 256, %s133_s25, [#allocation6], %s995_s29, %s995_s29, %s996_s30  }
  0x13   : > { %776 = dma.hbm_to_vmem [thread:$0]  (!%p771_p10), %s145_s28, 256, %s147_s5, [#allocation6], %s995_s29, %s995_s29, %s996_s30  }
  0x14   : > { %p34_p12 = scmp.ne.s32.totalorder %s988_s14, %s984_s13  ;;  %p25_p13 = scmp.eq.s32.totalorder %s24_s8, 0 }
  0x15   : > { %p35_p0 = scmp.eq.s32.totalorder %s992_s15, 0  ;;  %p787_p5 = scmp.lt.s32.totalorder %s992_s15, 2 }
  0x16   : > { %p1093_p3 = por %p106_p2, %p34_p12  ;;  %s160_s11 = sand.u32 1, %s988_s14  }
  0x17   : > { %s1099_s10 = scalar_select %p25_p13, %s988_s14, %s27_s7  }
  0x18   : > { %p36_p7 = por %p35_p0, %p34_p12  ;;  %s695_s17 = sshll.u32 %s160_s11, 4 }
  0x19   : > { %s756_s20 = sshll.u32 %s992_s15, 4  ;;  %s164_s25 = scalar_lea.vmem [#allocation2], %s695_s17 }
  0x1a   : > { %s169_s24 = scalar_lea.hbm %s1271_s0, %s756_s20  ;;  %s172_s26 = sshll.u32 %s164_s25, 4  ;;  %s173_s26 = int_to_ptr.vmem [resolvable:$true] %s172_s26 }
  0x1b   : > { %s170_s27 = sshll.u32 %s169_s24, 4  ;;  %p1106_p2 = pnand %p787_p5, %p36_p7  ;;  %s171_s27 = int_to_ptr.hbm [resolvable:$true] %s170_s27 }
  0x1c   : > { %s161_s4 = scalar_lea.sflag [#allocation3], %s160_s11  ;;  %s892_s5 = sshra.s32 %s171_s27, 4  ;;  %s893_s5 = int_to_ptr.hbm [resolvable:$true] %s892_s5 }
  0x1d   : > { %s894_s7 = scalar_lea.hbm %s893_s5, 16  ;;  %p896_p10 = pneg %p1106_p2 }
  0x1e   : > { %p895_p9 = scmp.ne.s32.totalorder %s893_s5, %s894_s7  ;;  %s899_s20 = scalar_lea.hbm %s1271_s0, 32 }
  0x1f   : > { %p900_p0 = scmp.lt.s32.totalorder %s893_s5, %s1271_s0  ;;  %p901_p5 = scmp.lt.s32.totalorder %s899_s20, %s894_s7 }
  0x20   : > { %p897_p12 = pnand %p896_p10, %p895_p9 }
  0x21   : > { %p902_p7 = por %p901_p5, %p900_p0 }
  0x22   : > { %p898_p13 = pneg %p897_p12 }
  0x24   : > { %p903_p11 = pnand %p902_p7, %p898_p13 }
  0x26   : > { %906 = shalt.err (!%p903_p11)
}
  0x27   : > { %780 = dma.hbm_to_vmem [thread:$0]  (!%p1106_p2), %s171_s27, 256, %s173_s26, %s161_s4, %s995_s29, %s995_s29, %s996_s30  }
  0x28   : > { %184 = sbr.rel (%p1064_p8) target bundleno = 397 (0x18d), region = 32  ;;  %s1126_s11 = sand.u32 (!%p1064_p8), 1, %s984_s13  }
  0x29   : > { %s699_s24 = sshll.u32 (!%p1064_p8), %s1126_s11, 4  ;;  %s187_s25 = scalar_lea.sflag (!%p1064_p8), [#allocation3], %s1126_s11 }
  0x2a   : > { %s1132_s5 = scalar_lea.vmem (!%p1064_p8), [#allocation2], %s699_s24 }
  0x2d   : > { %967 = dma.done.wait (%p1051_p4), %s187_s25, 256  }
  0x2e   : > { %969 = vsyncadd (%p1051_p4), %s187_s25, 4294967040 }
  0x2f   : > { %971 = dma.done.wait (%p41_p1), [#allocation6], 512  }
  0x30   : > { %973 = vsyncadd (%p41_p1), [#allocation6], 4294966784  ;;  %v226_v0 = vlaneseq  ;;  %v998_v14 = vmov 1.0   ;;  %v1168_v20 = vld [vmem:[%s1132_s5] sm:$0xff]  ;;  %v1171_v21 = vld [vmem:[%s1132_s5 + $0x8] sm:$0xff]  ;;  %s757_s18 = sshll.u32 %s1042_s16, 4 }
  0x31   : > { %v497_v27 = vadd.f32 %v1171_v21, %v1168_v20  ;;  %s594_s30 = scalar_lea.hbm %s1274_s3, %s757_s18  ;;  %s223_s26 = scalar_lea.vmem [#allocation8], %s699_s24 }
  0x32   : > { %v1142_v1 = vshrl.u32 %v226_v0, 7  ;;  %v436_v2 = vand.u32 127, %v226_v0  ;;  %s595_s27 = sshll.u32 %s223_s26, 4  ;;  %s597_s28 = sshll.u32 %s594_s30, 4  ;;  %s596_s27 = int_to_ptr.vmem [resolvable:$true] %s595_s27  ;;  %s598_s28 = int_to_ptr.hbm [resolvable:$true] %s597_s28 }
  0x33   : > { %v498_v30 = vrot.slane %v497_v27, 4  ;;  %s583_s16 = scalar_lea.sflag [#allocation4], %s1126_s11  ;;  %s936_s4 = sshra.s32 %s598_s28, 4  ;;  %s937_s4 = int_to_ptr.hbm [resolvable:$true] %s936_s4 }
  0x34   : > { %v242_v3 = vadd.s32 120, %v1142_v1  ;;  %v1145_v4 = vand.u32 63, %v436_v2  ;;  %v241_v5 = vadd.s32 112, %v1142_v1  ;;  %v240_v6 = vadd.s32 104, %v1142_v1  ;;  %s938_s7 = scalar_lea.hbm %s937_s4, 16  ;;  %s942_s20 = scalar_lea.hbm %s1274_s3, 32 }
  0x35   : > { %v239_v7 = vadd.s32 96, %v1142_v1  ;;  %v238_v11 = vadd.s32 88, %v1142_v1  ;;  %v237_v13 = vadd.s32 80, %v1142_v1  ;;  %v236_v16 = vadd.s32 72, %v1142_v1  ;;  %p939_p1 = scmp.ne.s32.totalorder %s937_s4, %s938_s7  ;;  %p943_p11 = scmp.lt.s32.totalorder %s937_s4, %s1274_s3 }
  0x36   : > { %v352_v8 = vand.u32 63, %v242_v3  ;;  %v345_v9 = vand.u32 63, %v241_v5  ;;  %v338_v10 = vand.u32 63, %v240_v6  ;;  %v235_v19 = vadd.s32 64, %v1142_v1  ;;  %p944_p2 = scmp.lt.s32.totalorder %s942_s20, %s938_s7 }
  0x37   : > { %v331_v12 = vand.u32 63, %v239_v7  ;;  %v324_v15 = vand.u32 63, %v238_v11  ;;  %v317_v18 = vand.u32 63, %v237_v13  ;;  %v310_v22 = vand.u32 63, %v236_v16  ;;  %v572_v13 = vld [vmem:[#allocation7 + $0x8] sm:$0xff]  ;;  %p940_p4 = pnand %p939_p1, %p1093_p3 }
  0x38   : > { %vm464_vm0 = vcmp.eq.s32.totalorder %v352_v8, %v1145_v4  ;;  %vm463_vm1 = vcmp.eq.s32.totalorder %v345_v9, %v1145_v4  ;;  %vm462_vm2 = vcmp.eq.s32.totalorder %v338_v10, %v1145_v4  ;;  %v234_v23 = vadd.s32 56, %v1142_v1  ;;  %v569_v8 = vld [vmem:[#allocation5] sm:$0xff]  ;;  %v570_v9 = vld [vmem:[#allocation5 + $0x8] sm:$0xff]  ;;  %p945_p9 = por %p944_p2, %p943_p11 }
  0x39   : > { %719 = vmatpush.msk.msra.mxu0 %vm464_vm0, %v998_v14  ;;  %735 = vmatpush.msk.msra.mxu1 %vm464_vm0, %v998_v14  ;;  %vm1160_vm3 = vcmp.eq.s32.totalorder %v331_v12, %v1145_v4  ;;  %vm460_vm4 = vcmp.eq.s32.totalorder %v324_v15, %v1145_v4  ;;  %vm1180_vm5 = vcmp.eq.s32.totalorder %v317_v18, %v1145_v4  ;;  %v303_v25 = vand.u32 63, %v235_v19  ;;  %v571_v12 = vld [vmem:[#allocation7] sm:$0xff]  ;;  %p941_p8 = pneg %p940_p4 }
  0x3a   : > { %v233_v26 = vadd.s32 48, %v1142_v1  ;;  %vm458_vm6 = vcmp.eq.s32.totalorder %v310_v22, %v1145_v4  ;;  %v296_v28 = vand.u32 63, %v234_v23  ;;  %v232_v29 = vadd.s32 40, %v1142_v1 }
  0x3b   : > { %720 = vmatpush.msk.msra.mxu0 %vm463_vm1, %v998_v14  ;;  %736 = vmatpush.msk.msra.mxu1 %vm463_vm1, %v998_v14  ;;  %vm457_vm7 = vcmp.eq.s32.totalorder %v303_v25, %v1145_v4  ;;  %v231_v32 = vadd.s32 32, %v1142_v1  ;;  %v499_v33 = vadd.f32 %v498_v30, %v497_v27  ;;  %v230_v35 = vadd.s32 24, %v1142_v1  ;;  %p946_p10 = pnand %p945_p9, %p941_p8 }
  0x3c   : > { %v289_v31 = vand.u32 63, %v233_v26  ;;  %vm456_vm8 = vcmp.eq.s32.totalorder %v296_v28, %v1145_v4  ;;  %v282_v34 = vand.u32 63, %v232_v29  ;;  %v229_v37 = vadd.s32 16, %v1142_v1 }
  0x3d   : > { %721 = vmatpush.msk.msra.mxu0 %vm462_vm2, %v998_v14  ;;  %737 = vmatpush.msk.msra.mxu1 %vm462_vm2, %v998_v14  ;;  %v275_v36 = vand.u32 63, %v231_v32  ;;  %v500_v38 = vrot.slane %v499_v33, 2  ;;  %v268_v39 = vand.u32 63, %v230_v35  ;;  %v228_v40 = vadd.s32 8, %v1142_v1 }
  0x3e   : > { %vm455_vm9 = vcmp.eq.s32.totalorder %v289_v31, %v1145_v4  ;;  %vm454_vm10 = vcmp.eq.s32.totalorder %v282_v34, %v1145_v4  ;;  %v261_v41 = vand.u32 63, %v229_v37  ;;  %v247_v44 = vand.u32 63, %v1142_v1 }
  0x3f   : > { %722 = vmatpush.msk.msra.mxu0 %vm1160_vm3, %v998_v14  ;;  %738 = vmatpush.msk.msra.mxu1 %vm1160_vm3, %v998_v14  ;;  %vm453_vm11 = vcmp.eq.s32.totalorder %v275_v36, %v1145_v4  ;;  %v501_v42 = vadd.f32 %v500_v38, %v499_v33  ;;  %vm452_vm12 = vcmp.eq.s32.totalorder %v268_v39, %v1145_v4  ;;  %v254_v43 = vand.u32 63, %v228_v40 }
  0x40   : > { %vm451_vm13 = vcmp.eq.s32.totalorder %v261_v41, %v1145_v4  ;;  %vm449_vm15 = vcmp.eq.s32.totalorder %v247_v44, %v1145_v4 }
  0x41   : > { %723 = vmatpush.msk.msra.mxu0 %vm460_vm4, %v998_v14  ;;  %739 = vmatpush.msk.msra.mxu1 %vm460_vm4, %v998_v14  ;;  %v502_v45 = vrot.slane %v501_v42, 1  ;;  %vm450_vm14 = vcmp.eq.s32.totalorder %v254_v43, %v1145_v4 }
  0x43   : > { %724 = vmatpush.msk.msra.mxu0 %vm1180_vm5, %v998_v14  ;;  %740 = vmatpush.msk.msra.mxu1 %vm1180_vm5, %v998_v14  ;;  %v503_v46 = vadd.f32 %v502_v45, %v501_v42 }
  0x45   : > { %725 = vmatpush.msk.msra.mxu0 %vm458_vm6, %v998_v14  ;;  %741 = vmatpush.msk.msra.mxu1 %vm458_vm6, %v998_v14 }
  0x47   : > { %726 = vmatpush.msk.msra.mxu0 %vm457_vm7, %v998_v14  ;;  %742 = vmatpush.msk.msra.mxu1 %vm457_vm7, %v998_v14 }
  0x49   : > { %727 = vmatpush.msk.msra.mxu0 %vm456_vm8, %v998_v14  ;;  %743 = vmatpush.msk.msra.mxu1 %vm456_vm8, %v998_v14 }
  0x4b   : > { %728 = vmatpush.msk.msra.mxu0 %vm455_vm9, %v998_v14  ;;  %744 = vmatpush.msk.msra.mxu1 %vm455_vm9, %v998_v14 }
  0x4d   : > { %729 = vmatpush.msk.msra.mxu0 %vm454_vm10, %v998_v14  ;;  %745 = vmatpush.msk.msra.mxu1 %vm454_vm10, %v998_v14 }
  0x4f   : > { %730 = vmatpush.msk.msra.mxu0 %vm453_vm11, %v998_v14  ;;  %746 = vmatpush.msk.msra.mxu1 %vm453_vm11, %v998_v14 }
  0x51   : > { %731 = vmatpush.msk.msra.mxu0 %vm452_vm12, %v998_v14  ;;  %747 = vmatpush.msk.msra.mxu1 %vm452_vm12, %v998_v14 }
  0x53   : > { %732 = vmatpush.msk.msra.mxu0 %vm451_vm13, %v998_v14  ;;  %748 = vmatpush.msk.msra.mxu1 %vm451_vm13, %v998_v14 }
  0x55   : > { %733 = vmatpush.msk.msra.mxu0 %vm450_vm14, %v998_v14  ;;  %749 = vmatpush.msk.msra.mxu1 %vm450_vm14, %v998_v14 }
  0x57   : > { %734 = vmatpush.msk.msra.mxu0 %vm449_vm15, %v998_v14  ;;  %750 = vmatpush.msk.msra.mxu1 %vm449_vm15, %v998_v14 }
  0x58   : > { %520 = vmatmul.f32.vlgmr.msra.gmra.mxu0 %v503_v46 }
  0xd5   : > { %v521_v47 = vpop.f32.mrf.mxu0 }
  0xd6   : > { %v524_v48 = vmul.f32 0.03125, %v521_v47 }
  0xd8   : > { %v525_v49 = vperm.slane %v524_v48, 0 }
  0xda   : > { %v526_v50 = vsub.f32 %v1168_v20, %v525_v49  ;;  %v527_v51 = vsub.f32 %v1171_v21, %v525_v49 }
  0xdc   : > { %v528_v52 = vmul.f32 %v526_v50, %v526_v50  ;;  %v529_v53 = vmul.f32 %v527_v51, %v527_v51 }
  0xde   : > { %v530_v54 = vadd.f32 %v529_v53, %v528_v52 }
  0xe0   : > { %v531_v55 = vrot.slane %v530_v54, 4 }
  0xe2   : > { %v532_v56 = vadd.f32 %v531_v55, %v530_v54 }
  0xe4   : > { %v533_v57 = vrot.slane %v532_v56, 2 }
  0xe6   : > { %v534_v58 = vadd.f32 %v533_v57, %v532_v56 }
  0xe8   : > { %v535_v59 = vrot.slane %v534_v58, 1 }
  0xea   : > { %v536_v60 = vadd.f32 %v535_v59, %v534_v58 }
  0xec   : > { %553 = vmatmul.f32.vlgmr.msra.gmra.mxu1 %v536_v60 }
 0x169   : > { %v554_v61 = vpop.f32.mrf.mxu1 }
 0x16a   : > { %v557_v62 = vmul.f32 0.03125, %v554_v61 }
 0x16c   : > { %v558_v63 = vadd.f32 1e-06, %v557_v62 }
 0x16e   : > { %830 = vrsqrt.f32 %v558_v63  ;;  %vm565_vm1 = vweird.f32 %v558_v63 }
 0x174   : > { %v831_v0 = vpop.eup %830 }
 0x175   : > { %v560_v1 = vmul.f32 %v831_v0, %v558_v63  ;;  %vm566_vm0 = vweird.f32 %v831_v0 }
 0x176   : > { %vm567_vm2 = vmor %vm565_vm1, %vm566_vm0 }
 0x177   : > { %v561_v2 = vmul.f32 %v831_v0, %v560_v1 }
 0x179   : > { %v562_v3 = vmul.f32 0.5, %v561_v2 }
 0x17b   : > { %v563_v4 = vsub.f32 1.5, %v562_v3 }
 0x17d   : > { %v564_v5 = vmul.f32 %v831_v0, %v563_v4 }
 0x17f   : > { %v568_v6 = vsel %vm567_vm2, %v831_v0, %v564_v5 }
 0x180   : > { %v573_v7 = vperm.slane %v568_v6, 0 }
 0x182   : > { %v574_v10 = vmul.f32 %v573_v7, %v526_v50  ;;  %v575_v11 = vmul.f32 %v573_v7, %v527_v51 }
 0x184   : > { %v576_v14 = vmul.f32 %v574_v10, %v569_v8  ;;  %v577_v15 = vmul.f32 %v575_v11, %v570_v9 }
 0x186   : > { %v578_v16 = vadd.f32 %v576_v14, %v571_v12  ;;  %v579_v17 = vadd.f32 %v577_v15, %v572_v13 }
 0x188   : > { %580 = vst [vmem:[%s223_s26] sm:$0xff] %v578_v16 }
 0x189   : > { %581 = vst [vmem:[%s223_s26 + $0x8] sm:$0xff] %v579_v17 }
 0x18a   : > { %949 = shalt.err (!%p946_p10)
}
 0x18b   : > { %s999_s11 = smov 128   ;;  %s1000_s24 = smov 8  }
 0x18c   : > { %768 = dma.vmem_to_hbm [thread:$0]  (%p1093_p3), %s596_s27, 256, %s598_s28, %s583_s16, %s999_s11, %s999_s11, %s1000_s24  }
 0x18d PF: > { %s612_s25 = sand.u32 1, %s980_s12   ;;  %p1284_p12 = scmp.ge.s32.totalorder %s992_s15, 2 }
 0x18e   : > { %s613_s5 = scalar_lea.sflag [#allocation4], %s612_s25 }
 0x18f   : > { %p782_p13 = pnand %p1284_p12, %p1056_p6 }
 0x191   : > { %p783_p0 = pneg %p782_p13 }
 0x193   : > { %975 = dma.done.wait (%p783_p0), %s613_s5, 256  }
 0x194   : > { %977 = vsyncadd (%p783_p0), %s613_s5, 4294967040  ;;  %p17_p5 = scmp.ge.s32.totalorder %s1083_s6, 4   ;;  %s1285_s12 = smov %s984_s13 }
 0x195   : > { %s1286_s13 = smov %s988_s14  ;;  %s1287_s14 = smov %s1099_s10 }
 0x196   : > { %s1288_s15 = smov %s1083_s6  ;;  %19 = sbr.rel (!%p17_p5) target bundleno = 6 (0x6), region = 85 }
 0x19b   :  { %619 = vsyncpa [#allocation3], 1 }
 0x19c   :  { %621 = vsyncpa [#allocation3 + $0x1], 1 }
 0x19d   :  { %622 = vsyncpa [#allocation6], 1 }
 0x19e   :  { %623 = vsyncpa [#allocation4], 1 }
 0x19f   :  { %625 = vsyncpa [#allocation4 + $0x1], 1 }

</bundles_post_ra>
